<compile_context>
chip_gen: v5e
topology: v5e:2x2
jax: 0.10.0
libtpu: 0.0.40
codegen_flags: <defaults>
</compile_context>

<pallas_src>
import math
from functools import partial

import jax
import jax.numpy as jnp
from jax.experimental import pallas as pl
from jax.experimental.pallas import tpu as pltpu


BLOCK_EXPANSION = 1   # standard BMKP/GPM BasicBlock
_BN_EPS = 1e-5


def _round_up(x: int, m: int) -> int:
    return ((x + m - 1) // m) * m


def _pick_tile(dim: int, max_tile: int, align: int) -> int:
    """Largest `align`-multiple tile <= max_tile that divides round_up(dim, align)."""
    padded = _round_up(dim, align)
    if padded <= max_tile:
        return padded
    best = align
    t = 2 * align
    while t <= max_tile:
        if padded % t == 0:
            best = t
        t += align
    return best


# ---------------------------------------------------------------------------
# Tiled matmul (+ optional bias) — the single MXU workhorse kernel.
# ---------------------------------------------------------------------------
def _matmul_bias_kernel(x_ref, w_ref, b_ref, o_ref, acc_ref):
    k = pl.program_id(2)

    @pl.when(k == 0)
    def _init():
        acc_ref[...] = jnp.zeros_like(acc_ref)

    acc_ref[...] += jnp.dot(x_ref[...], w_ref[...],
                            preferred_element_type=jnp.float32)

    @pl.when(k == pl.num_programs(2) - 1)
    def _store():
        o_ref[...] = (acc_ref[...] + b_ref[...].astype(jnp.float32)).astype(o_ref.dtype)


def _matmul_kernel(x_ref, w_ref, o_ref, acc_ref):
    k = pl.program_id(2)

    @pl.when(k == 0)
    def _init():
        acc_ref[...] = jnp.zeros_like(acc_ref)

    acc_ref[...] += jnp.dot(x_ref[...], w_ref[...],
                            preferred_element_type=jnp.float32)

    @pl.when(k == pl.num_programs(2) - 1)
    def _store():
        o_ref[...] = acc_ref[...].astype(o_ref.dtype)


def pallas_matmul(x, w, bias=None, *, tm=256, tn=256, tk=1024, out_dtype=None):
    """out = x @ w (+ bias).  x: [M, K], w: [K, N] (already K-major), bias: [N]."""
    M, K = x.shape
    K2, N = w.shape
    assert K == K2, (x.shape, w.shape)
    out_dtype = out_dtype or x.dtype

    # Adaptive, lane-dense tiles that evenly divide the padded dims (no
    # over-padding of the reduction axis): N/K tiles multiples of 128, M of 8.
    tm_ = _pick_tile(M, tm, 8)
    tn_ = _pick_tile(N, tn, 128)
    tk_ = _pick_tile(K, tk, 128)
    Mp, Np, Kp = _round_up(M, tm_), _round_up(N, tn_), _round_up(K, tk_)

    xp = x if (Mp == M and Kp == K) else jnp.pad(x, ((0, Mp - M), (0, Kp - K)))
    wp = w if (Kp == K and Np == N) else jnp.pad(w, ((0, Kp - K), (0, Np - N)))

    in_specs = [
        pl.BlockSpec((tm_, tk_), lambda i, j, k: (i, k)),
        pl.BlockSpec((tk_, tn_), lambda i, j, k: (k, j)),
    ]
    args = [xp, wp]
    if bias is not None:
        bp = bias.reshape(1, N)
        if Np != N:
            bp = jnp.pad(bp, ((0, 0), (0, Np - N)))
        in_specs.append(pl.BlockSpec((1, tn_), lambda i, j, k: (0, j)))
        args.append(bp)
        kernel = _matmul_bias_kernel
    else:
        kernel = _matmul_kernel

    out = pl.pallas_call(
        kernel,
        out_shape=jax.ShapeDtypeStruct((Mp, Np), out_dtype),
        grid_spec=pltpu.PrefetchScalarGridSpec(
            num_scalar_prefetch=0,
            grid=(Mp // tm_, Np // tn_, Kp // tk_),
            in_specs=in_specs,
            out_specs=pl.BlockSpec((tm_, tn_), lambda i, j, k: (i, j)),
            scratch_shapes=[pltpu.VMEM((tm_, tn_), jnp.float32)],
        ),
        compiler_params=pltpu.CompilerParams(
            dimension_semantics=("parallel", "parallel", "arbitrary"),
            vmem_limit_bytes=32 * 1024 * 1024,
        ),
    )(*args)
    if Mp != M or Np != N:
        out = out[:M, :N]
    return out


# ---------------------------------------------------------------------------
# Fused per-channel scale/shift (+ BN'd or identity residual) (+ ReLU).
# Lane-dense layout: rows = N*H, lanes = W*C (channel scale tiled along W).
# ---------------------------------------------------------------------------
def _bn_act_kernel(x_ref, s_ref, b_ref, o_ref, *, apply_relu):
    y = x_ref[...].astype(jnp.float32) * s_ref[...] + b_ref[...]
    if apply_relu:
        y = jnp.maximum(y, 0.0)
    o_ref[...] = y.astype(o_ref.dtype)


def _bn_add_act_kernel(x_ref, s_ref, b_ref, r_ref, o_ref, *, apply_relu):
    y = x_ref[...].astype(jnp.float32) * s_ref[...] + b_ref[...]
    y = y + r_ref[...].astype(jnp.float32)
    if apply_relu:
        y = jnp.maximum(y, 0.0)
    o_ref[...] = y.astype(o_ref.dtype)


def _bn_bn_add_act_kernel(x_ref, s_ref, b_ref, r_ref, rs_ref, rb_ref, o_ref, *,
                          apply_relu):
    y = x_ref[...].astype(jnp.float32) * s_ref[...] + b_ref[...]
    y = y + (r_ref[...].astype(jnp.float32) * rs_ref[...] + rb_ref[...])
    if apply_relu:
        y = jnp.maximum(y, 0.0)
    o_ref[...] = y.astype(o_ref.dtype)


def pallas_bn_act(x_nhwc, scale, shift, *, relu=True,
                  residual=None, res_scale=None, res_shift=None):
    """y = [relu]( x*scale+shift  [+ residual  or  + residual*res_scale+res_shift] ).

    Per-channel scale/shift; computed with a lane-dense (N*H, W*C) layout so the
    output last dim is >= 128 lanes for every layer instead of C (as small as 8).
    """
    N, H, W, C = x_nhwc.shape
    lane = W * C
    M = N * H

    def tile_ch(v):
        return jnp.tile(v.astype(jnp.float32), W).reshape(1, lane)

    x2 = x_nhwc.reshape(M, lane)
    s2, b2 = tile_ch(scale), tile_ch(shift)

    # Row tile: multiple of 8, each f32 buffer kept under ~2 MiB.
    tm_ = min(512, max(8, ((2 << 20) // (4 * lane)) // 8 * 8))
    tm_ = min(tm_, _round_up(M, 8))
    Mp = _round_up(M, tm_)
    if Mp != M:
        x2 = jnp.pad(x2, ((0, Mp - M), (0, 0)))

    in_specs = [
        pl.BlockSpec((tm_, lane), lambda i: (i, 0)),
        pl.BlockSpec((1, lane), lambda i: (0, 0)),
        pl.BlockSpec((1, lane), lambda i: (0, 0)),
    ]
    args = [x2, s2, b2]

    if residual is not None:
        r2 = residual.reshape(M, lane)
        if Mp != M:
            r2 = jnp.pad(r2, ((0, Mp - M), (0, 0)))
        in_specs.append(pl.BlockSpec((tm_, lane), lambda i: (i, 0)))
        args.append(r2)
        if res_scale is not None:
            in_specs.append(pl.BlockSpec((1, lane), lambda i: (0, 0)))
            in_specs.append(pl.BlockSpec((1, lane), lambda i: (0, 0)))
            args.append(tile_ch(res_scale))
            args.append(tile_ch(res_shift))
            kernel = partial(_bn_bn_add_act_kernel, apply_relu=relu)
        else:
            kernel = partial(_bn_add_act_kernel, apply_relu=relu)
    else:
        kernel = partial(_bn_act_kernel, apply_relu=relu)

    out = pl.pallas_call(
        kernel,
        out_shape=jax.ShapeDtypeStruct((Mp, lane), x_nhwc.dtype),
        grid_spec=pltpu.PrefetchScalarGridSpec(
            num_scalar_prefetch=0,
            grid=(Mp // tm_,),
            in_specs=in_specs,
            out_specs=pl.BlockSpec((tm_, lane), lambda i: (i, 0)),
        ),
        compiler_params=pltpu.CompilerParams(
            dimension_semantics=("parallel",),
            vmem_limit_bytes=32 * 1024 * 1024,
        ),
    )(*args)
    if Mp != M:
        out = out[:M]
    return out.reshape(N, H, W, C)


# ---------------------------------------------------------------------------
# Conv wrappers (MyConv2d with bias=False, padding_mode='zeros', groups=1).
# ---------------------------------------------------------------------------
def conv3x3_pallas(x, w_hwio, stride=1):
    """3x3 conv, padding=1, no bias.  x: [N,H,W,Ci] (NHWC), w: [3,3,Ci,Co] (HWIO)."""
    N, H, W, Ci = x.shape
    Co = w_hwio.shape[-1]
    Ho = (H - 1) // stride + 1
    Wo = (W - 1) // stride + 1
    xp = jnp.pad(x, ((0, 0), (1, 1), (1, 1), (0, 0)))
    # im2col: 9 shifted views; the heavy matmul runs in the Pallas kernel.
    # TODO(synk): move patch extraction into the kernel (halo-tiled 9-tap MXU
    # accumulation) to avoid the 9x im2col materialization at large feature maps.
    cols = []
    for kh in range(3):
        for kw in range(3):
            cols.append(xp[:, kh::stride, kw::stride, :][:, :Ho, :Wo, :])
    patches = jnp.concatenate(cols, axis=-1).reshape(N * Ho * Wo, 9 * Ci)
    out = pallas_matmul(patches, w_hwio.reshape(9 * Ci, Co))
    return out.reshape(N, Ho, Wo, Co)


def conv1x1_pallas(x, w_io, stride=1):
    """1x1 conv (shortcut), padding=0, no bias.  w: [Ci, Co]."""
    xs = x[:, ::stride, ::stride, :]
    N, Ho, Wo, Ci = xs.shape
    Co = w_io.shape[1]
    return pallas_matmul(xs.reshape(N * Ho * Wo, Ci), w_io).reshape(N, Ho, Wo, Co)


def reconstruct_conv_weight_hwio(basis, weight_, out_channels, in_channels, ksize=3):
    """MyConv2d low-rank path: torch.mm(basis_, weight_).view(O, I, kh, kw).
    Call ONCE when (basis_, weight_) change and cache the HWIO result — do NOT
    recompute per forward call (saves a full weight-sized HBM round trip)."""
    w_oihw = jnp.matmul(basis, weight_).reshape(out_channels, in_channels, ksize, ksize)
    return jnp.transpose(w_oihw, (2, 3, 1, 0))


# ---------------------------------------------------------------------------
# Op dispatch: Pallas implementation vs plain-XLA reference (for checking).
# ---------------------------------------------------------------------------
def _conv3x3(x, w, stride, use_pallas):
    if use_pallas:
        return conv3x3_pallas(x, w, stride)
    return jax.lax.conv_general_dilated(
        x, w, (stride, stride), ((1, 1), (1, 1)),
        dimension_numbers=("NHWC", "HWIO", "NHWC"),
        precision=jax.lax.Precision.HIGHEST)


def _conv1x1(x, w, stride, use_pallas):
    if use_pallas:
        return conv1x1_pallas(x, w, stride)
    w4 = w.reshape(1, 1, *w.shape)
    return jax.lax.conv_general_dilated(
        x, w4, (stride, stride), ((0, 0), (0, 0)),
        dimension_numbers=("NHWC", "HWIO", "NHWC"),
        precision=jax.lax.Precision.HIGHEST)


def _bn_scale_shift(x, bn, training):
    # TODO(synk): BatchNorm running-stat (momentum) updates are a training-time
    # side effect and are not modelled; forward uses batch statistics exactly
    # like the PyTorch module in .train() mode (training=False -> running stats).
    if training:
        mean = jnp.mean(x, axis=(0, 1, 2))
        var = jnp.var(x, axis=(0, 1, 2))
    else:
        mean, var = bn["mean"], bn["var"]
    scale = bn["gamma"].astype(jnp.float32) * jax.lax.rsqrt(var.astype(jnp.float32) + _BN_EPS)
    shift = bn["beta"].astype(jnp.float32) - mean.astype(jnp.float32) * scale
    return scale, shift


def _apply_bn(x, scale, shift, *, relu, residual=None, res_scale=None,
              res_shift=None, use_pallas=True):
    if use_pallas:
        return pallas_bn_act(x, scale, shift, relu=relu, residual=residual,
                             res_scale=res_scale, res_shift=res_shift)
    y = x.astype(jnp.float32) * scale + shift
    if residual is not None:
        r = residual.astype(jnp.float32)
        if res_scale is not None:
            r = r * res_scale + res_shift
        y = y + r
    if relu:
        y = jnp.maximum(y, 0.0)
    return y.astype(x.dtype)


# ---------------------------------------------------------------------------
# Parameter init (matches PyTorch kaiming_uniform_(a=sqrt(5)) / BN defaults),
# with weights stored pre-transposed once (HWIO convs, [in,out] linear).
# ---------------------------------------------------------------------------
def _kaiming_uniform(key, shape, fan_in, dtype):
    bound = 1.0 / math.sqrt(fan_in)          # a=sqrt(5) -> bound = 1/sqrt(fan_in)
    return jax.random.uniform(key, shape, dtype, minval=-bound, maxval=bound)


def _init_conv3x3(key, cin, cout, dtype):
    return _kaiming_uniform(key, (3, 3, cin, cout), cin * 9, dtype)   # HWIO


def _init_conv1x1(key, cin, cout, dtype):
    return _kaiming_uniform(key, (cin, cout), cin, dtype)             # [Ci, Co]


def _init_bn(c, dtype):
    return dict(gamma=jnp.ones((c,), dtype), beta=jnp.zeros((c,), dtype),
                mean=jnp.zeros((c,), jnp.float32), var=jnp.ones((c,), jnp.float32))


def init_resnet_params(key, num_blocks, nc, nt, nf, img_size, dtype=jnp.float32):
    # TODO(synk): the `block` class is not part of the provided spec; the
    # standard BMKP/GPM BasicBlock (expansion=1) is assumed here.
    params = {"img_size": img_size, "nt": nt}
    key, k = jax.random.split(key)
    params["conv1"] = _init_conv3x3(k, 3, nf, dtype)
    params["bn1s"] = [_init_bn(nf, dtype) for _ in range(nt)]

    blocks = []
    in_planes = nf
    for planes, first_stride, nb in zip([nf, nf * 2, nf * 4, nf * 8],
                                        [1, 2, 2, 2], num_blocks):
        for s in [first_stride] + [1] * (nb - 1):
            key, k1, k2, k3 = jax.random.split(key, 4)
            blk = {
                "stride": s,
                "conv1": _init_conv3x3(k1, in_planes, planes, dtype),
                "bn1s": [_init_bn(planes, dtype) for _ in range(nt)],
                "conv2": _init_conv3x3(k2, planes, planes, dtype),
                "bn2s": [_init_bn(planes, dtype) for _ in range(nt)],
            }
            if s != 1 or in_planes != planes * BLOCK_EXPANSION:
                blk["shortcut"] = _init_conv1x1(k3, in_planes, planes * BLOCK_EXPANSION, dtype)
                blk["bn3s"] = [_init_bn(planes * BLOCK_EXPANSION, dtype) for _ in range(nt)]
            else:
                blk["shortcut"] = None
            blocks.append(blk)
            in_planes = planes * BLOCK_EXPANSION
    params["blocks"] = blocks

    lin_in = nf * 8 * BLOCK_EXPANSION * (img_size // 16) ** 2
    key, kl = jax.random.split(key)
    params["linear"] = _kaiming_uniform(kl, (lin_in, nc), lin_in, dtype)  # [in, out], bias=False
    return params


# ---------------------------------------------------------------------------
# Forward pass (mirrors ResNet.forward / BasicBlock.forward).
# ---------------------------------------------------------------------------
def basic_block_forward(blk, x, task_id, use_pallas=True, training=True):
    s = blk["stride"]
    out = _conv3x3(x, blk["conv1"], s, use_pallas)
    s1, b1 = _bn_scale_shift(out, blk["bn1s"][task_id], training)
    out = _apply_bn(out, s1, b1, relu=True, use_pallas=use_pallas)

    out = _conv3x3(out, blk["conv2"], 1, use_pallas)
    s2, b2 = _bn_scale_shift(out, blk["bn2s"][task_id], training)

    if blk["shortcut"] is None:
        # bn2 + identity residual + relu fused in one lane-dense elementwise pass
        return _apply_bn(out, s2, b2, relu=True, residual=x, use_pallas=use_pallas)

    sc = _conv1x1(x, blk["shortcut"], s, use_pallas)
    s3, b3 = _bn_scale_shift(sc, blk["bn3s"][task_id], training)
    # bn2 + (bn3 of shortcut) + add + relu fused in one elementwise pass:
    # removes a full feature-map write+read vs. a separate shortcut-BN pass.
    return _apply_bn(out, s2, b2, relu=True, residual=sc,
                     res_scale=s3, res_shift=b3, use_pallas=use_pallas)


def resnet_forward(params, x, task_id, use_pallas=True, training=True):
    """Mirrors ResNet.forward(x, task_id).  x: [B, 3, img, img] (NCHW)."""
    bsz = x.shape[0]
    img = params["img_size"]
    x = x.reshape(bsz, 3, img, img)
    x = jnp.transpose(x, (0, 2, 3, 1))        # NHWC: channels ride the lane dim

    out = _conv3x3(x, params["conv1"], 1, use_pallas)
    # TODO(synk): self.act['conv_in'] stash and nn.Dropout (declared but never
    # called in the reference forward) are Python-side state and are omitted.
    s0, b0 = _bn_scale_shift(out, params["bn1s"][task_id], training)
    out = _apply_bn(out, s0, b0, relu=True, use_pallas=use_pallas)

    for blk in params["blocks"]:
        out = basic_block_forward(blk, out, task_id, use_pallas, training)

    # avg_pool2d(out, 2): tiny 2x2 mean — left to XLA (a standalone pallas_call
    # would be pure overhead at this size).
    n, h, w, c = out.shape
    out = out.reshape(n, h // 2, 2, w // 2, 2, c).mean(axis=(2, 4))
    # flatten in PyTorch NCHW order so feature ordering matches the nn.Linear
    out = jnp.transpose(out, (0, 3, 1, 2)).reshape(n, -1)

    if use_pallas:
        return pallas_matmul(out, params["linear"])          # bias=False
    return jnp.matmul(out, params["linear"], precision=jax.lax.Precision.HIGHEST)


# ---------------------------------------------------------------------------
if __name__ == "__main__":
    key = jax.random.PRNGKey(0)
    kp, kx, ka, kb, kc = jax.random.split(key, 5)

    # Small, spec-consistent demo shapes: batch=2, 3x16x16 images, nf=8,
    # num_blocks=[1,1,1,1], nt=2 tasks, nc=10 classes.
    batch, nc, nt, nf, img_size = 2, 10, 2, 8, 16
    num_blocks = [1, 1, 1, 1]

    params = init_resnet_params(kp, num_blocks, nc, nt, nf, img_size)
    x = jax.random.normal(kx, (batch, 3, img_size, img_size), dtype=jnp.float32)

    y = resnet_forward(params, x, task_id=0, use_pallas=True)
    y = jax.block_until_ready(y)
    assert y.shape == (batch, nc), y.shape
    assert bool(jnp.all(jnp.isfinite(y)))

    # sanity check against a plain-JAX/XLA reference of the same forward
    y_ref = jax.block_until_ready(resnet_forward(params, x, task_id=0, use_pallas=False))
    assert jnp.allclose(y, y_ref, atol=5e-3, rtol=5e-3)

    # also exercise the bias epilogue of the matmul kernel (MyConv2d/nn.Linear
    # with bias=True would use this path)
    a = jax.random.normal(ka, (8, 32), jnp.float32)
    b = jax.random.normal(kb, (32, 16), jnp.float32)
    c = jax.random.normal(kc, (16,), jnp.float32)
    mb = jax.block_until_ready(pallas_matmul(a, b, bias=c))
    assert jnp.allclose(mb, a @ b + c, atol=1e-4, rtol=1e-4)

    print("KERNEL_OK")
</pallas_src>

<mosaic_0001>
module attributes {stable_mosaic.version = 11 : i64} {
  func.func @_matmul_kernel(%arg0: i32, %arg1: i32, %arg2: i32, %arg3: memref<256x128xf32, #tpu.memory_space<vmem>>, %arg4: memref<128x128xf32, #tpu.memory_space<vmem>>, %arg5: memref<256x128xf32, #tpu.memory_space<vmem>>, %arg6: memref<256x128xf32, #tpu.memory_space<vmem>>) attributes {dimension_semantics = [#tpu.dimension_semantics<parallel>, #tpu.dimension_semantics<parallel>, #tpu.dimension_semantics<arbitrary>], iteration_bounds = array<i64: 2, 1, 1>, scalar_prefetch = 0 : i64, scratch_operands = 1 : i64, tpu.core_type = #tpu.core_type<tc>, window_params = [{transform_indices = @transform_0, window_bounds = array<i64: 256, 128>}, {transform_indices = @transform_1, window_bounds = array<i64: 128, 128>}, {transform_indices = @transform_2, window_bounds = array<i64: 256, 128>}]} {
    %c0_i32 = arith.constant 0 : i32
    %0 = arith.cmpi eq, %arg2, %c0_i32 : i32
    %1 = arith.extui %0 : i1 to i32
    %c0_i32_0 = arith.constant 0 : i32
    %2 = arith.cmpi ne, %1, %c0_i32_0 : i32
    scf.if %2 {
      %cst_10 = arith.constant 0.000000e+00 : f32
      %12 = vector.broadcast %cst_10 : f32 to vector<256x128xf32>
      %c0_11 = arith.constant 0 : index
      %c0_12 = arith.constant 0 : index
      %13 = vector.load %arg6[%c0_11, %c0_12] : memref<256x128xf32, #tpu.memory_space<vmem>>, vector<256x128xf32>
      tpu.vector_store %arg6[%c0_11, %c0_12], %12 {strides = array<i32>} : memref<256x128xf32, #tpu.memory_space<vmem>>, vector<256x128xf32>,
    } else {
    }
    %c0 = arith.constant 0 : index
    %c0_1 = arith.constant 0 : index
    %3 = vector.load %arg6[%c0, %c0_1] : memref<256x128xf32, #tpu.memory_space<vmem>>, vector<256x128xf32>
    %c0_2 = arith.constant 0 : index
    %c0_3 = arith.constant 0 : index
    %4 = vector.load %arg3[%c0_2, %c0_3] : memref<256x128xf32, #tpu.memory_space<vmem>>, vector<256x128xf32>
    %c0_4 = arith.constant 0 : index
    %c0_5 = arith.constant 0 : index
    %5 = vector.load %arg4[%c0_4, %c0_5] : memref<128x128xf32, #tpu.memory_space<vmem>>, vector<128x128xf32>
    %cst = arith.constant dense<0.000000e+00> : vector<256x128xf32>
    %6 = tpu.matmul %4, %5, %cst {dimension_numbers = #tpu.dot_dimension_numbers<[1], [0], [0], [1], [0, 0, 1, 1], [], []>} : vector<256x128xf32>, vector<128x128xf32>, vector<256x128xf32> -> vector<256x128xf32>
    %7 = arith.addf %3, %6 : vector<256x128xf32>
    %c0_6 = arith.constant 0 : index
    %c0_7 = arith.constant 0 : index
    %8 = vector.load %arg6[%c0_6, %c0_7] : memref<256x128xf32, #tpu.memory_space<vmem>>, vector<256x128xf32>
    tpu.vector_store %arg6[%c0_6, %c0_7], %7 {strides = array<i32>} : memref<256x128xf32, #tpu.memory_space<vmem>>, vector<256x128xf32>,
    %c0_i32_8 = arith.constant 0 : i32
    %9 = arith.cmpi eq, %arg2, %c0_i32_8 : i32
    %10 = arith.extui %9 : i1 to i32
    %c0_i32_9 = arith.constant 0 : i32
    %11 = arith.cmpi ne, %10, %c0_i32_9 : i32
    scf.if %11 {
      %c0_10 = arith.constant 0 : index
      %c0_11 = arith.constant 0 : index
      %12 = vector.load %arg6[%c0_10, %c0_11] : memref<256x128xf32, #tpu.memory_space<vmem>>, vector<256x128xf32>
      %c0_12 = arith.constant 0 : index
      %c0_13 = arith.constant 0 : index
      %13 = vector.load %arg5[%c0_12, %c0_13] : memref<256x128xf32, #tpu.memory_space<vmem>>, vector<256x128xf32>
      tpu.vector_store %arg5[%c0_12, %c0_13], %12 {strides = array<i32>} : memref<256x128xf32, #tpu.memory_space<vmem>>, vector<256x128xf32>,
    } else {
    }
    return
  }
  func.func @transform_0(%arg0: i32, %arg1: i32, %arg2: i32) -> (i32, i32) {
    %c0_i32 = arith.constant 0 : i32
    return %arg0, %arg2 : i32, i32
  }
  func.func @transform_1(%arg0: i32, %arg1: i32, %arg2: i32) -> (i32, i32) {
    %c0_i32 = arith.constant 0 : i32
    return %arg2, %arg1 : i32, i32
  }
  func.func @transform_2(%arg0: i32, %arg1: i32, %arg2: i32) -> (i32, i32) {
    %c0_i32 = arith.constant 0 : i32
    return %arg0, %arg1 : i32, i32
  }
}

</mosaic_0001>

<bundles_post_ra>
// kernel: tpu_custom_call.1
= control target key start
LH: loop header
LB: loop body
LE: loop exit
PB: predicated region body
PF: predicated region fallthrough
CT: control target
= control target key end

     0   :  { %7 = vsyncpa [#allocation4], 0  ;;  %s1238_s0 = inlined_call_operand.hbm [shape: f32[512,128], index: 0, kind: input, shape index: {}]   ;;  %s1239_s1 = inlined_call_operand.hbm [shape: f32[128,128], index: 1, kind: input, shape index: {}]   ;;  %s1240_s2 = inlined_call_operand.hbm [shape: f32[512,128], index: 2, kind: output, shape index: {}]  }
   0x1   :  { %9 = vsyncpa [#allocation4 + $0x1], 0 }
   0x2   :  { %10 = vsyncpa [#allocation7], 0 }
   0x3   :  { %11 = vsyncpa [#allocation5], 0 }
   0x4   :  { %13 = vsyncpa [#allocation5 + $0x1], 0  ;;  %s1010_s9 = smov 0   ;;  %s1012_s10 = smov 0  }
   0x5   :  { %s1014_s11 = smov 0   ;;  %s1016_s12 = smov 0  }
   0x6   :  { %s1018_s13 = smov 0   ;;  %s1020_s14 = smov 0  }
   0x7 LB: > { %s698_s15 = sadd.s32 4294967295, %s988_s14   ;;  %s699_s16 = sadd.s32 4294967294, %s988_s14   ;;  %s988_s14 = sphi %s1020_s14, %s19_s14   ;;  %s984_s13 = sphi %s1018_s13, %s1252_s13   ;;  %s980_s12 = sphi %s1016_s12, %s1251_s12   ;;  %s976_s11 = sphi %s1014_s11, %s1250_s11   ;;  %s972_s10 = sphi %s1012_s10, %s1249_s10   ;;  %s968_s9 = sphi %s1010_s9, %s1248_s9  }
   0x8   : > { %p60_p0 = scmp.ne.s32.totalorder %s972_s10, %s968_s9  ;;  %p1044_p1 = scmp.eq.s32.totalorder %s698_s15, 0 }
   0x9   : > { %p1048_p2 = scmp.eq.s32.totalorder %s698_s15, 1  ;;  %p120_p3 = scmp.eq.s32.totalorder %s699_s16, 1 }
   0xa   : > { %p1054_p4 = por %p1044_p1, %p60_p0  ;;  %p700_p5 = scmp.ge.s32.totalorder %s988_s14, 1 }
   0xb   : > { %p1059_p6 = por %p120_p3, %p60_p0  ;;  %p127_p7 = scmp.lt.s32.totalorder %s988_s14, 3 }
   0xc   : > { %s142_s23 = sshll.u32 %s1239_s1, 4  ;;  %s990_s25 = smov [#allocation6]   ;;  %s143_s23 = int_to_ptr.hbm [resolvable:$true] %s142_s23 }
   0xd   : > { %p1067_p8 = pnand %p700_p5, %p127_p7  ;;  %s144_s26 = sshll.u32 %s990_s25, 4  ;;  %s145_s26 = int_to_ptr.vmem [resolvable:$true] %s144_s26 }
   0xe   : > { %p702_p11 = scmp.ge.s32.totalorder %s988_s14, 2  ;;  %s991_s27 = smov 128  }
   0xf   : > { %p773_p9 = pneg %p1067_p8  ;;  %s992_s28 = smov 8  }
  0x10   : > { %s38_s29 = sadd.s32 1, %s984_s13  ;;  %s47_s30 = sadd.s32 1, %s976_s11 }
  0x11   : > { %p774_p10 = pnand %p773_p9, %p1044_p1  ;;  %p40_p12 = scmp.ge.s32.totalorder %s38_s29, 2 }
  0x12   : > { %p54_p13 = scmp.ne.s32.totalorder %s976_s11, %s972_s10  ;;  %p55_p0 = scmp.eq.s32.totalorder %s988_s14, 0 }
  0x13   : > { %776 = dma.hbm_to_vmem [thread:$0]  (!%p774_p10), %s143_s23, 2048, %s145_s26, [#allocation7], %s991_s27, %s991_s27, %s992_s28  }
  0x14   : > { %s1254_s29 = smov (%p40_p12, %s38_s29), 0  ;;  %p1086_p3 = por %p55_p0, %p54_p13 }
  0x15   : > { %p1092_p5 = por %p1048_p2, %p54_p13  ;;  %s42_s5 = ssub.s32 %s984_s13, %s1254_s29 }
  0x16   : > { %p786_p7 = scmp.lt.s32.totalorder %s988_s14, 2  ;;  %p45_p9 = scmp.eq.s32.totalorder %s42_s5, 0 }
  0x17   : > { %s158_s6 = sand.u32 1, %s976_s11   ;;  %s715_s15 = sshll.u32 %s984_s13, 8 }
  0x18   : > { %s703_s7 = sshll.u32 %s158_s6, 8  ;;  %s168_s22 = scalar_lea.hbm %s1238_s0, %s715_s15 }
  0x19   : > { %s1101_s8 = scalar_select %p45_p9, %s976_s11, %s47_s30  }
  0x1a   : > { %s162_s23 = scalar_lea.vmem [#allocation3], %s703_s7  ;;  %s169_s18 = sshll.u32 %s168_s22, 4  ;;  %s170_s18 = int_to_ptr.hbm [resolvable:$true] %s169_s18 }
  0x1b   : > { %s171_s25 = sshll.u32 %s162_s23, 4  ;;  %p778_p2 = pnand %p786_p7, %p1086_p3  ;;  %s172_s25 = int_to_ptr.vmem [resolvable:$true] %s171_s25 }
  0x1c   : > { %s159_s26 = scalar_lea.sflag [#allocation4], %s158_s6  ;;  %183 = sbr.rel (%p1067_p8) target bundleno = 261 (0x105), region = 28 }
  0x1d   : > { %780 = dma.hbm_to_vmem [thread:$0]  (!%p778_p2), %s170_s18, 4096, %s172_s25, %s159_s26, %s991_s27, %s991_s27, %s992_s28  }
  0x1e   : > { %s1115_s30 = sand.u32 (!%p1067_p8), 1, %s972_s10  }
  0x1f   : > { %s707_s5 = sshll.u32 (!%p1067_p8), %s1115_s30, 8  ;;  %s186_s7 = scalar_lea.sflag (!%p1067_p8), [#allocation4], %s1115_s30 }
  0x20   : > { %s1121_s3 = scalar_lea.vmem (!%p1067_p8), [#allocation3], %s707_s5 }
  0x21   : > { %955 = dma.done.wait (%p1054_p4), %s186_s7, 4096  }
  0x22   : > { %957 = vsyncadd (%p1054_p4), %s186_s7, 4294963200 }
  0x23   : > { %959 = dma.done.wait (%p1044_p1), [#allocation7], 2048  }
  0x24   : > { %961 = vsyncadd (%p1044_p1), [#allocation7], 4294965248  ;;  %v334_v0 = vld [vmem:[#allocation6 + $0x78] sm:$0xff]  ;;  %v333_v1 = vld [vmem:[#allocation6 + $0x70] sm:$0xff]  ;;  %s1165_s17 = scalar_lea.vmem [#allocation8], %s707_s5  ;;  %s716_s19 = sshll.u32 %s980_s12, 8 }
  0x25   : > { %718 = vmatpush.msra.mxu2 %v334_v0  ;;  %719 = vmatpush.msra.mxu3 %v334_v0  ;;  %v332_v2 = vld [vmem:[#allocation6 + $0x68] sm:$0xff]  ;;  %v331_v3 = vld [vmem:[#allocation6 + $0x60] sm:$0xff]  ;;  %v330_v4 = vld [vmem:[#allocation6 + $0x58] sm:$0xff]  ;;  %s592_s28 = scalar_lea.hbm %s1240_s2, %s716_s19  ;;  %s593_s6 = sshll.u32 %s1165_s17, 4  ;;  %s594_s6 = int_to_ptr.vmem [resolvable:$true] %s593_s6 }
  0x26   : > { %335 = vmatpush.msra.mxu0 %v334_v0  ;;  %717 = vmatpush.msra.mxu1 %v334_v0  ;;  %v329_v5 = vld [vmem:[#allocation6 + $0x50] sm:$0xff]  ;;  %v328_v6 = vld [vmem:[#allocation6 + $0x48] sm:$0xff]  ;;  %v327_v7 = vld [vmem:[#allocation6 + $0x40] sm:$0xff]  ;;  %s595_s15 = sshll.u32 %s592_s28, 4  ;;  %s580_s12 = scalar_lea.sflag [#allocation5], %s1115_s30  ;;  %s596_s15 = int_to_ptr.hbm [resolvable:$true] %s595_s15 }
  0x27   : > { %721 = vmatpush.msra.mxu2 %v333_v1  ;;  %722 = vmatpush.msra.mxu3 %v333_v1  ;;  %v326_v8 = vld [vmem:[#allocation6 + $0x38] sm:$0xff]  ;;  %v325_v9 = vld [vmem:[#allocation6 + $0x30] sm:$0xff]  ;;  %v324_v10 = vld [vmem:[#allocation6 + $0x28] sm:$0xff]  ;;  %s916_s16 = sshra.s32 %s596_s15, 4  ;;  %s922_s25 = scalar_lea.hbm %s1240_s2, 512  ;;  %s917_s16 = int_to_ptr.hbm [resolvable:$true] %s916_s16 }
  0x28   : > { %336 = vmatpush.msra.mxu0 %v333_v1  ;;  %720 = vmatpush.msra.mxu1 %v333_v1  ;;  %v323_v11 = vld [vmem:[#allocation6 + $0x20] sm:$0xff]  ;;  %v322_v12 = vld [vmem:[#allocation6 + $0x18] sm:$0xff]  ;;  %v321_v13 = vld [vmem:[#allocation6 + $0x10] sm:$0xff]  ;;  %s918_s21 = scalar_lea.hbm %s917_s16, 256  ;;  %p923_p10 = scmp.lt.s32.totalorder %s917_s16, %s1240_s2 }
  0x29   : > { %724 = vmatpush.msra.mxu2 %v332_v2  ;;  %725 = vmatpush.msra.mxu3 %v332_v2  ;;  %v320_v14 = vld [vmem:[#allocation6 + $0x8] sm:$0xff]  ;;  %v319_v15 = vld [vmem:[#allocation6] sm:$0xff]  ;;  %v305_v24 = vld [vmem:[%s1121_s3 + $0x90] sm:$0xff]  ;;  %p919_p1 = scmp.ne.s32.totalorder %s917_s16, %s918_s21  ;;  %p924_p12 = scmp.lt.s32.totalorder %s922_s25, %s918_s21 }
  0x2a   : > { %337 = vmatpush.msra.mxu0 %v332_v2  ;;  %723 = vmatpush.msra.mxu1 %v332_v2  ;;  %v303_v16 = vld [vmem:[%s1121_s3 + $0x80] sm:$0xff]  ;;  %v304_v20 = vld [vmem:[%s1121_s3 + $0x88] sm:$0xff]  ;;  %v313_v25 = vld [vmem:[%s1121_s3 + $0xd0] sm:$0xff] }
  0x2b   : > { %727 = vmatpush.msra.mxu2 %v331_v3  ;;  %728 = vmatpush.msra.mxu3 %v331_v3  ;;  %v311_v17 = vld [vmem:[%s1121_s3 + $0xc0] sm:$0xff]  ;;  %v312_v21 = vld [vmem:[%s1121_s3 + $0xc8] sm:$0xff]  ;;  %v289_v26 = vld [vmem:[%s1121_s3 + $0x10] sm:$0xff]  ;;  %p920_p4 = pnand %p919_p1, %p1092_p5  ;;  %p925_p13 = por %p924_p12, %p923_p10 }
  0x2c   : > { %338 = vmatpush.msra.mxu0 %v331_v3  ;;  %726 = vmatpush.msra.mxu1 %v331_v3  ;;  %v287_v18 = vld [vmem:[%s1121_s3] sm:$0xff]  ;;  %v288_v22 = vld [vmem:[%s1121_s3 + $0x8] sm:$0xff]  ;;  %v297_v27 = vld [vmem:[%s1121_s3 + $0x50] sm:$0xff] }
  0x2d   : > { %730 = vmatpush.msra.mxu2 %v330_v4  ;;  %731 = vmatpush.msra.mxu3 %v330_v4  ;;  %v295_v19 = vld [vmem:[%s1121_s3 + $0x40] sm:$0xff]  ;;  %v296_v23 = vld [vmem:[%s1121_s3 + $0x48] sm:$0xff]  ;;  %v306_v28 = vld [vmem:[%s1121_s3 + $0x98] sm:$0xff]  ;;  %p921_p8 = pneg %p920_p4 }
  0x2e   : > { %339 = vmatpush.msra.mxu0 %v330_v4  ;;  %729 = vmatpush.msra.mxu1 %v330_v4  ;;  %v314_v29 = vld [vmem:[%s1121_s3 + $0xd8] sm:$0xff]  ;;  %v307_v32 = vld [vmem:[%s1121_s3 + $0xa0] sm:$0xff]  ;;  %v308_v36 = vld [vmem:[%s1121_s3 + $0xa8] sm:$0xff] }
  0x2f   : > { %733 = vmatpush.msra.mxu2 %v329_v5  ;;  %734 = vmatpush.msra.mxu3 %v329_v5  ;;  %v290_v30 = vld [vmem:[%s1121_s3 + $0x18] sm:$0xff]  ;;  %v315_v33 = vld [vmem:[%s1121_s3 + $0xe0] sm:$0xff]  ;;  %v316_v37 = vld [vmem:[%s1121_s3 + $0xe8] sm:$0xff]  ;;  %p926_p0 = pnand %p925_p13, %p921_p8 }
  0x30   : > { %340 = vmatpush.msra.mxu0 %v329_v5  ;;  %732 = vmatpush.msra.mxu1 %v329_v5  ;;  %v298_v31 = vld [vmem:[%s1121_s3 + $0x58] sm:$0xff]  ;;  %v291_v34 = vld [vmem:[%s1121_s3 + $0x20] sm:$0xff]  ;;  %v292_v38 = vld [vmem:[%s1121_s3 + $0x28] sm:$0xff] }
  0x31   : > { %736 = vmatpush.msra.mxu2 %v328_v6  ;;  %737 = vmatpush.msra.mxu3 %v328_v6  ;;  %v299_v35 = vld [vmem:[%s1121_s3 + $0x60] sm:$0xff]  ;;  %v300_v39 = vld [vmem:[%s1121_s3 + $0x68] sm:$0xff]  ;;  %v309_v40 = vld [vmem:[%s1121_s3 + $0xb0] sm:$0xff] }
  0x32   : > { %341 = vmatpush.msra.mxu0 %v328_v6  ;;  %735 = vmatpush.msra.mxu1 %v328_v6  ;;  %v317_v41 = vld [vmem:[%s1121_s3 + $0xf0] sm:$0xff]  ;;  %v310_v44 = vld [vmem:[%s1121_s3 + $0xb8] sm:$0xff] }
  0x33   : > { %739 = vmatpush.msra.mxu2 %v327_v7  ;;  %740 = vmatpush.msra.mxu3 %v327_v7  ;;  %v293_v42 = vld [vmem:[%s1121_s3 + $0x30] sm:$0xff]  ;;  %v318_v45 = vld [vmem:[%s1121_s3 + $0xf8] sm:$0xff] }
  0x34   : > { %342 = vmatpush.msra.mxu0 %v327_v7  ;;  %738 = vmatpush.msra.mxu1 %v327_v7  ;;  %v301_v43 = vld [vmem:[%s1121_s3 + $0x70] sm:$0xff]  ;;  %v294_v46 = vld [vmem:[%s1121_s3 + $0x38] sm:$0xff] }
  0x35   : > { %742 = vmatpush.msra.mxu2 %v326_v8  ;;  %743 = vmatpush.msra.mxu3 %v326_v8  ;;  %v302_v47 = vld [vmem:[%s1121_s3 + $0x78] sm:$0xff] }
  0x36   : > { %343 = vmatpush.msra.mxu0 %v326_v8  ;;  %741 = vmatpush.msra.mxu1 %v326_v8 }
  0x37   : > { %745 = vmatpush.msra.mxu2 %v325_v9  ;;  %746 = vmatpush.msra.mxu3 %v325_v9 }
  0x38   : > { %344 = vmatpush.msra.mxu0 %v325_v9  ;;  %744 = vmatpush.msra.mxu1 %v325_v9 }
  0x39   : > { %748 = vmatpush.msra.mxu2 %v324_v10  ;;  %749 = vmatpush.msra.mxu3 %v324_v10 }
  0x3a   : > { %345 = vmatpush.msra.mxu0 %v324_v10  ;;  %747 = vmatpush.msra.mxu1 %v324_v10 }
  0x3b   : > { %751 = vmatpush.msra.mxu2 %v323_v11  ;;  %752 = vmatpush.msra.mxu3 %v323_v11 }
  0x3c   : > { %346 = vmatpush.msra.mxu0 %v323_v11  ;;  %750 = vmatpush.msra.mxu1 %v323_v11 }
  0x3d   : > { %754 = vmatpush.msra.mxu2 %v322_v12  ;;  %755 = vmatpush.msra.mxu3 %v322_v12 }
  0x3e   : > { %347 = vmatpush.msra.mxu0 %v322_v12  ;;  %753 = vmatpush.msra.mxu1 %v322_v12 }
  0x3f   : > { %757 = vmatpush.msra.mxu2 %v321_v13  ;;  %758 = vmatpush.msra.mxu3 %v321_v13 }
  0x40   : > { %348 = vmatpush.msra.mxu0 %v321_v13  ;;  %756 = vmatpush.msra.mxu1 %v321_v13 }
  0x41   : > { %760 = vmatpush.msra.mxu2 %v320_v14  ;;  %761 = vmatpush.msra.mxu3 %v320_v14 }
  0x42   : > { %349 = vmatpush.msra.mxu0 %v320_v14  ;;  %759 = vmatpush.msra.mxu1 %v320_v14 }
  0x43   : > { %763 = vmatpush.msra.mxu2 %v319_v15  ;;  %764 = vmatpush.msra.mxu3 %v319_v15 }
  0x44   : > { %399 = vmatmul.f32.vlgmr.msra.gmra.mxu2 %v303_v16  ;;  %423 = vmatmul.f32.vlgmr.msra.gmra.mxu3 %v311_v17 }
  0x45   : > { %350 = vmatpush.msra.mxu0 %v319_v15  ;;  %762 = vmatpush.msra.mxu1 %v319_v15 }
  0x46   : > { %351 = vmatmul.f32.vlgmr.msra.gmra.mxu0 %v287_v18  ;;  %375 = vmatmul.f32.vlgmr.msra.gmra.mxu1 %v295_v19 }
  0x4c   : > { %402 = vmatmul.f32.gmra.mxu2 %v304_v20  ;;  %426 = vmatmul.f32.gmra.mxu3 %v312_v21 }
  0x4e   : > { %354 = vmatmul.f32.gmra.mxu0 %v288_v22  ;;  %378 = vmatmul.f32.gmra.mxu1 %v296_v23 }
  0x54   : > { %405 = vmatmul.f32.gmra.mxu2 %v305_v24  ;;  %429 = vmatmul.f32.gmra.mxu3 %v313_v25 }
  0x56   : > { %357 = vmatmul.f32.gmra.mxu0 %v289_v26  ;;  %381 = vmatmul.f32.gmra.mxu1 %v297_v27 }
  0x5c   : > { %408 = vmatmul.f32.gmra.mxu2 %v306_v28  ;;  %432 = vmatmul.f32.gmra.mxu3 %v314_v29 }
  0x5e   : > { %360 = vmatmul.f32.gmra.mxu0 %v290_v30  ;;  %384 = vmatmul.f32.gmra.mxu1 %v298_v31 }
  0x64   : > { %411 = vmatmul.f32.gmra.mxu2 %v307_v32  ;;  %435 = vmatmul.f32.gmra.mxu3 %v315_v33 }
  0x66   : > { %363 = vmatmul.f32.gmra.mxu0 %v291_v34  ;;  %387 = vmatmul.f32.gmra.mxu1 %v299_v35 }
  0x6c   : > { %414 = vmatmul.f32.gmra.mxu2 %v308_v36  ;;  %438 = vmatmul.f32.gmra.mxu3 %v316_v37 }
  0x6e   : > { %366 = vmatmul.f32.gmra.mxu0 %v292_v38  ;;  %390 = vmatmul.f32.gmra.mxu1 %v300_v39 }
  0x74   : > { %417 = vmatmul.f32.gmra.mxu2 %v309_v40  ;;  %441 = vmatmul.f32.gmra.mxu3 %v317_v41 }
  0x76   : > { %369 = vmatmul.f32.gmra.mxu0 %v293_v42  ;;  %393 = vmatmul.f32.gmra.mxu1 %v301_v43 }
  0x7c   : > { %420 = vmatmul.f32.gmra.mxu2 %v310_v44  ;;  %444 = vmatmul.f32.gmra.mxu3 %v318_v45 }
  0x7e   : > { %372 = vmatmul.f32.gmra.mxu0 %v294_v46  ;;  %396 = vmatmul.f32.gmra.mxu1 %v302_v47 }
  0xc3   : > { %v352_v48 = vpop.f32.mrf.mxu0  ;;  %v376_v49 = vpop.f32.mrf.mxu1 }
  0xc4   : > { %547 = vst [vmem:[%s1165_s17] sm:$0xff] %v352_v48 }
  0xc5   : > { %555 = vst [vmem:[%s1165_s17 + $0x40] sm:$0xff] %v376_v49 }
  0xc7   : > { %v400_v50 = vpop.f32.mrf.mxu2  ;;  %v424_v51 = vpop.f32.mrf.mxu3 }
  0xc8   : > { %563 = vst [vmem:[%s1165_s17 + $0x80] sm:$0xff] %v400_v50 }
  0xc9   : > { %571 = vst [vmem:[%s1165_s17 + $0xc0] sm:$0xff] %v424_v51 }
  0xcb   : > { %v355_v52 = vpop.f32.mrf.mxu0  ;;  %v379_v53 = vpop.f32.mrf.mxu1 }
  0xcc   : > { %548 = vst [vmem:[%s1165_s17 + $0x8] sm:$0xff] %v355_v52 }
  0xcd   : > { %556 = vst [vmem:[%s1165_s17 + $0x48] sm:$0xff] %v379_v53 }
  0xcf   : > { %v403_v54 = vpop.f32.mrf.mxu2  ;;  %v427_v55 = vpop.f32.mrf.mxu3 }
  0xd0   : > { %564 = vst [vmem:[%s1165_s17 + $0x88] sm:$0xff] %v403_v54 }
  0xd1   : > { %572 = vst [vmem:[%s1165_s17 + $0xc8] sm:$0xff] %v427_v55 }
  0xd3   : > { %v358_v56 = vpop.f32.mrf.mxu0  ;;  %v382_v57 = vpop.f32.mrf.mxu1 }
  0xd4   : > { %549 = vst [vmem:[%s1165_s17 + $0x10] sm:$0xff] %v358_v56 }
  0xd5   : > { %557 = vst [vmem:[%s1165_s17 + $0x50] sm:$0xff] %v382_v57 }
  0xd7   : > { %v406_v58 = vpop.f32.mrf.mxu2  ;;  %v430_v59 = vpop.f32.mrf.mxu3 }
  0xd8   : > { %565 = vst [vmem:[%s1165_s17 + $0x90] sm:$0xff] %v406_v58 }
  0xd9   : > { %573 = vst [vmem:[%s1165_s17 + $0xd0] sm:$0xff] %v430_v59 }
  0xdb   : > { %v361_v60 = vpop.f32.mrf.mxu0  ;;  %v385_v61 = vpop.f32.mrf.mxu1 }
  0xdc   : > { %550 = vst [vmem:[%s1165_s17 + $0x18] sm:$0xff] %v361_v60 }
  0xdd   : > { %558 = vst [vmem:[%s1165_s17 + $0x58] sm:$0xff] %v385_v61 }
  0xdf   : > { %v409_v62 = vpop.f32.mrf.mxu2  ;;  %v433_v63 = vpop.f32.mrf.mxu3 }
  0xe0   : > { %566 = vst [vmem:[%s1165_s17 + $0x98] sm:$0xff] %v409_v62 }
  0xe1   : > { %574 = vst [vmem:[%s1165_s17 + $0xd8] sm:$0xff] %v433_v63 }
  0xe3   : > { %v364_v0 = vpop.f32.mrf.mxu0  ;;  %v388_v1 = vpop.f32.mrf.mxu1 }
  0xe4   : > { %551 = vst [vmem:[%s1165_s17 + $0x20] sm:$0xff] %v364_v0 }
  0xe5   : > { %559 = vst [vmem:[%s1165_s17 + $0x60] sm:$0xff] %v388_v1 }
  0xe7   : > { %v412_v2 = vpop.f32.mrf.mxu2  ;;  %v436_v3 = vpop.f32.mrf.mxu3 }
  0xe8   : > { %567 = vst [vmem:[%s1165_s17 + $0xa0] sm:$0xff] %v412_v2 }
  0xe9   : > { %575 = vst [vmem:[%s1165_s17 + $0xe0] sm:$0xff] %v436_v3 }
  0xeb   : > { %v367_v4 = vpop.f32.mrf.mxu0  ;;  %v391_v5 = vpop.f32.mrf.mxu1 }
  0xec   : > { %552 = vst [vmem:[%s1165_s17 + $0x28] sm:$0xff] %v367_v4 }
  0xed   : > { %560 = vst [vmem:[%s1165_s17 + $0x68] sm:$0xff] %v391_v5 }
  0xef   : > { %v415_v6 = vpop.f32.mrf.mxu2  ;;  %v439_v7 = vpop.f32.mrf.mxu3 }
  0xf0   : > { %568 = vst [vmem:[%s1165_s17 + $0xa8] sm:$0xff] %v415_v6 }
  0xf1   : > { %576 = vst [vmem:[%s1165_s17 + $0xe8] sm:$0xff] %v439_v7 }
  0xf3   : > { %v370_v8 = vpop.f32.mrf.mxu0  ;;  %v394_v9 = vpop.f32.mrf.mxu1 }
  0xf4   : > { %553 = vst [vmem:[%s1165_s17 + $0x30] sm:$0xff] %v370_v8 }
  0xf5   : > { %561 = vst [vmem:[%s1165_s17 + $0x70] sm:$0xff] %v394_v9 }
  0xf7   : > { %v418_v10 = vpop.f32.mrf.mxu2  ;;  %v442_v11 = vpop.f32.mrf.mxu3 }
  0xf8   : > { %569 = vst [vmem:[%s1165_s17 + $0xb0] sm:$0xff] %v418_v10 }
  0xf9   : > { %577 = vst [vmem:[%s1165_s17 + $0xf0] sm:$0xff] %v442_v11 }
  0xfb   : > { %v373_v12 = vpop.f32.mrf.mxu0  ;;  %v397_v13 = vpop.f32.mrf.mxu1 }
  0xfc   : > { %554 = vst [vmem:[%s1165_s17 + $0x38] sm:$0xff] %v373_v12 }
  0xfd   : > { %562 = vst [vmem:[%s1165_s17 + $0x78] sm:$0xff] %v397_v13 }
  0xff   : > { %v421_v14 = vpop.f32.mrf.mxu2  ;;  %v445_v15 = vpop.f32.mrf.mxu3 }
 0x100   : > { %570 = vst [vmem:[%s1165_s17 + $0xb8] sm:$0xff] %v421_v14 }
 0x101   : > { %578 = vst [vmem:[%s1165_s17 + $0xf8] sm:$0xff] %v445_v15 }
 0x102   : > { %929 = shalt.err (!%p926_p0)
}
 0x103   : > { %s993_s30 = smov 128   ;;  %s994_s5 = smov 8  }
 0x104   : > { %771 = dma.vmem_to_hbm [thread:$0]  (%p1092_p5), %s594_s6, 4096, %s596_s15, %s580_s12, %s993_s30, %s993_s30, %s994_s5  }
 0x105 PF: > { %s610_s7 = sand.u32 1, %s968_s9   ;;  %p782_p3 = pnand %p702_p11, %p1059_p6 }
 0x106   : > { %s611_s3 = scalar_lea.sflag [#allocation5], %s610_s7 }
 0x107   : > { %p783_p7 = pneg %p782_p3 }
 0x109   : > { %963 = dma.done.wait (%p783_p7), %s611_s3, 4096  }
 0x10a   : > { %965 = vsyncadd (%p783_p7), %s611_s3, 4294963200  ;;  %s19_s14 = sadd.s32 1, %s988_s14   ;;  %s1248_s9 = smov %s972_s10 }
 0x10b   : > { %p16_p9 = scmp.ge.s32.totalorder %s19_s14, 4   ;;  %s1249_s10 = smov %s976_s11 }
 0x10c   : > { %s1250_s11 = smov %s1101_s8  ;;  %s1251_s12 = smov %s984_s13 }
 0x10d   : > { %s1252_s13 = smov %s1254_s29  ;;  %18 = sbr.rel (!%p16_p9) target bundleno = 7 (0x7), region = 86 }
 0x112   :  { %617 = vsyncpa [#allocation4], 1 }
 0x113   :  { %619 = vsyncpa [#allocation4 + $0x1], 1 }
 0x114   :  { %620 = vsyncpa [#allocation7], 1 }
 0x115   :  { %621 = vsyncpa [#allocation5], 1 }
 0x116   :  { %623 = vsyncpa [#allocation5 + $0x1], 1 }

</bundles_post_ra>
